<compile_context>
chip_gen: v5e
topology: v5e:2x2
jax: 0.10.0
libtpu: 0.0.40
codegen_flags: <defaults>
</compile_context>

<pallas_src>
import jax
import jax.numpy as jnp
from jax.experimental import pallas as pl
from jax.experimental.pallas import tpu as pltpu

BN_EPS = 1e-5
_LANE = 128
_SUBLANE = 8
_MAX_BATCH_TILE = 512      # max rows per batch tile
_MAX_FEATURE_TILE = 512    # N / K handled as a single tile up to this size
_WIDE_N_TILE = 256         # MXU-friendly N tile when N is wide
_WIDE_K_TILE = 512         # K tile when the contraction dim is wide


def _round_up(x: int, m: int) -> int:
    return (x + m - 1) // m * m


def _cdiv(a: int, b: int) -> int:
    return (a + b - 1) // b


# ----------------------------------------------------------------------------
# Pallas kernel: tiled (BN-folded) Linear + bias + ReLU with K-accumulation
# ----------------------------------------------------------------------------
def _mlp_block_kernel(x_ref, w_ref, b_ref, o_ref, acc_ref):
    k = pl.program_id(2)

    @pl.when(k == 0)
    def _():
        acc_ref[...] = jnp.zeros_like(acc_ref)

    acc_ref[...] += jnp.dot(
        x_ref[...], w_ref[...], preferred_element_type=jnp.float32
    )

    @pl.when(k == pl.num_programs(2) - 1)
    def _():
        z = acc_ref[...] + b_ref[...]          # bias broadcast over batch rows
        o_ref[...] = jnp.maximum(z, 0.0).astype(o_ref.dtype)   # ReLU (f32)


# ----------------------------------------------------------------------------
# One-time parameter preparation: BN fold (in f32), padding, bf16 cast.
# Call once; reuse the result for every forward.
# ----------------------------------------------------------------------------
def prepare_mlp_block_params(params):
    w, b = params["w"], params["b"]                       # w: [in, out]
    gamma, beta = params["gamma"], params["beta"]
    mean, var = params["mean"], params["var"]
    in_dim, out_dim = w.shape

    # Fold BatchNorm1d (eval) into the linear layer — in f32, before bf16 cast.
    scale = gamma * jax.lax.rsqrt(var + BN_EPS)           # [out]
    w_f = (w * scale[None, :]).astype(jnp.float32)        # [in, out]
    b_f = (b - mean) * scale + beta                       # [out]

    # K (contraction) tiling: lane-dense x tiles.
    k_pad = _round_up(max(in_dim, _LANE), _LANE)
    if k_pad <= _MAX_FEATURE_TILE:
        tk = k_pad
    else:
        tk = _WIDE_K_TILE
        k_pad = _round_up(k_pad, tk)

    # N (out-feature) tiling: lane-dense, unmasked output stores.
    n_pad = _round_up(max(out_dim, _LANE), _LANE)
    if n_pad <= _MAX_FEATURE_TILE:
        tn = n_pad
    else:
        tn = _WIDE_N_TILE
        n_pad = _round_up(n_pad, tn)

    w_p = jnp.pad(w_f, ((0, k_pad - in_dim), (0, n_pad - out_dim)))
    w_p = w_p.astype(jnp.bfloat16)
    b_p = jnp.pad(b_f, (0, n_pad - out_dim)).reshape(1, n_pad)
    b_p = b_p.astype(jnp.float32)

    return {
        "w": w_p, "b": b_p,
        "in_dim": in_dim, "out_dim": out_dim,
        "k_pad": k_pad, "n_pad": n_pad, "tk": tk, "tn": tn,
    }


# ----------------------------------------------------------------------------
# Forward wrapper: pads x (only), runs one fused pallas_call, slices result.
# ----------------------------------------------------------------------------
def mlp_block_forward(x, prep):
    """Eval-mode forward of MLPBlock for x: [B, in_dim] -> [B, out_dim]."""
    B, d_in = x.shape
    assert d_in == prep["in_dim"]
    k_pad, n_pad = prep["k_pad"], prep["n_pad"]
    tk, tn = prep["tk"], prep["tn"]
    out_dim = prep["out_dim"]
    w_p, b_p = prep["w"], prep["b"]

    # Batch tile: at most _MAX_BATCH_TILE rows, padding at most 7 rows.
    nb = _cdiv(B, _MAX_BATCH_TILE)
    tb = _round_up(_cdiv(B, nb), _SUBLANE)
    b_pad = _round_up(B, tb)

    x_p = jnp.pad(x.astype(jnp.bfloat16),
                  ((0, b_pad - B), (0, k_pad - d_in)))

    grid = (b_pad // tb, n_pad // tn, k_pad // tk)

    out = pl.pallas_call(
        _mlp_block_kernel,
        out_shape=jax.ShapeDtypeStruct((b_pad, n_pad), jnp.float32),
        grid_spec=pltpu.PrefetchScalarGridSpec(
            num_scalar_prefetch=0,
            grid=grid,
            in_specs=[
                pl.BlockSpec((tb, tk), lambda b, n, k: (b, k)),   # x tile
                pl.BlockSpec((tk, tn), lambda b, n, k: (k, n)),   # folded W
                pl.BlockSpec((1, tn), lambda b, n, k: (0, n)),    # folded bias
            ],
            out_specs=pl.BlockSpec((tb, tn), lambda b, n, k: (b, n)),
            scratch_shapes=[pltpu.VMEM((tb, tn), jnp.float32)],   # f32 acc
        ),
        compiler_params=pltpu.CompilerParams(
            dimension_semantics=("parallel", "parallel", "arbitrary"),
            vmem_limit_bytes=32 * 1024 * 1024,
        ),
        cost_estimate=pl.CostEstimate(
            flops=2 * b_pad * k_pad * n_pad,
            transcendentals=0,
            bytes_accessed=2 * (b_pad * k_pad + k_pad * n_pad)
            + 4 * (n_pad + b_pad * n_pad),
        ),
    )(x_p, w_p, b_p)

    return out[:B, :out_dim]


# ----------------------------------------------------------------------------
# Parameter construction (deterministic, mimics PyTorch defaults + nontrivial
# running stats so the BN fold is actually exercised)
# ----------------------------------------------------------------------------
def init_mlp_block_params(key, input_dim, output_dim):
    kw, kb, kg, kbeta, km, kv = jax.random.split(key, 6)
    bound = 1.0 / jnp.sqrt(input_dim)
    return {
        "w": jax.random.uniform(kw, (input_dim, output_dim), jnp.float32,
                                -bound, bound),
        "b": jax.random.uniform(kb, (output_dim,), jnp.float32, -bound, bound),
        "gamma": jax.random.uniform(kg, (output_dim,), jnp.float32, 0.5, 1.5),
        "beta": jax.random.uniform(kbeta, (output_dim,), jnp.float32, -0.1, 0.1),
        "mean": jax.random.uniform(km, (output_dim,), jnp.float32, -0.2, 0.2),
        "var": jax.random.uniform(kv, (output_dim,), jnp.float32, 0.5, 1.5),
    }


# ----------------------------------------------------------------------------
# Pure-JAX f32 reference (correctness check only)
# ----------------------------------------------------------------------------
def mlp_block_ref(x, params):
    z = x @ params["w"] + params["b"]
    z = ((z - params["mean"])
         * jax.lax.rsqrt(params["var"] + BN_EPS)
         * params["gamma"] + params["beta"])
    return jnp.maximum(z, 0.0)


if __name__ == "__main__":
    INPUT_DIM, OUTPUT_DIM = 16, 32

    key = jax.random.PRNGKey(0)
    key, kp = jax.random.split(key)
    params = init_mlp_block_params(kp, INPUT_DIM, OUTPUT_DIM)

    # One-time fold + pad (cached; not re-done per forward).
    prep = jax.block_until_ready(prepare_mlp_block_params(params))

    # Small batch (single grid step).
    key, kx = jax.random.split(key)
    x_small = jax.random.normal(kx, (8, INPUT_DIM), jnp.float32)
    y_small = jax.block_until_ready(mlp_block_forward(x_small, prep))
    ref_small = mlp_block_ref(x_small, params)
    assert y_small.shape == (8, OUTPUT_DIM), y_small.shape
    # bf16 x/W with f32 accumulation: loose-ish tolerance vs f32 reference.
    assert jnp.allclose(y_small, ref_small, atol=2e-2, rtol=2e-2)

    # Larger, non-aligned batch (exercises batch grid + minimal padding path).
    key, kx2 = jax.random.split(key)
    x_big = jax.random.normal(kx2, (520, INPUT_DIM), jnp.float32)
    y_big = jax.block_until_ready(mlp_block_forward(x_big, prep))
    ref_big = mlp_block_ref(x_big, params)
    assert y_big.shape == (520, OUTPUT_DIM), y_big.shape
    assert jnp.allclose(y_big, ref_big, atol=2e-2, rtol=2e-2)

    print("KERNEL_OK")
</pallas_src>

<mosaic_0001>
module attributes {stable_mosaic.version = 11 : i64} {
  func.func @_mlp_block_kernel(%arg0: i32, %arg1: i32, %arg2: i32, %arg3: memref<8x128xbf16, #tpu.memory_space<vmem>>, %arg4: memref<128x128xbf16, #tpu.memory_space<vmem>>, %arg5: memref<1x128xf32, #tpu.memory_space<vmem>>, %arg6: memref<8x128xf32, #tpu.memory_space<vmem>>, %arg7: memref<8x128xf32, #tpu.memory_space<vmem>>) attributes {dimension_semantics = [#tpu.dimension_semantics<parallel>, #tpu.dimension_semantics<parallel>, #tpu.dimension_semantics<arbitrary>], iteration_bounds = array<i64: 1, 1, 1>, scalar_prefetch = 0 : i64, scratch_operands = 1 : i64, tpu.core_type = #tpu.core_type<tc>, window_params = [{transform_indices = @transform_0, window_bounds = array<i64: 8, 128>}, {transform_indices = @transform_1, window_bounds = array<i64: 128, 128>}, {transform_indices = @transform_2, window_bounds = array<i64: 1, 128>}, {transform_indices = @transform_3, window_bounds = array<i64: 8, 128>}]} {
    %c0_i32 = arith.constant 0 : i32
    %0 = arith.cmpi eq, %arg2, %c0_i32 : i32
    %1 = arith.extui %0 : i1 to i32
    %c0_i32_0 = arith.constant 0 : i32
    %2 = arith.cmpi ne, %1, %c0_i32_0 : i32
    scf.if %2 {
      %cst_10 = arith.constant 0.000000e+00 : f32
      %12 = vector.broadcast %cst_10 : f32 to vector<8x128xf32>
      %c0_11 = arith.constant 0 : index
      %c0_12 = arith.constant 0 : index
      %13 = vector.load %arg7[%c0_11, %c0_12] : memref<8x128xf32, #tpu.memory_space<vmem>>, vector<8x128xf32>
      tpu.vector_store %arg7[%c0_11, %c0_12], %12 {strides = array<i32>} : memref<8x128xf32, #tpu.memory_space<vmem>>, vector<8x128xf32>,
    } else {
    }
    %c0 = arith.constant 0 : index
    %c0_1 = arith.constant 0 : index
    %3 = vector.load %arg7[%c0, %c0_1] : memref<8x128xf32, #tpu.memory_space<vmem>>, vector<8x128xf32>
    %c0_2 = arith.constant 0 : index
    %c0_3 = arith.constant 0 : index
    %4 = vector.load %arg3[%c0_2, %c0_3] : memref<8x128xbf16, #tpu.memory_space<vmem>>, vector<8x128xbf16>
    %c0_4 = arith.constant 0 : index
    %c0_5 = arith.constant 0 : index
    %5 = vector.load %arg4[%c0_4, %c0_5] : memref<128x128xbf16, #tpu.memory_space<vmem>>, vector<128x128xbf16>
    %cst = arith.constant dense<0.000000e+00> : vector<8x128xf32>
    %6 = tpu.matmul %4, %5, %cst {dimension_numbers = #tpu.dot_dimension_numbers<[1], [0], [0], [1], [0, 0, 1, 1], [], []>} : vector<8x128xbf16>, vector<128x128xbf16>, vector<8x128xf32> -> vector<8x128xf32>
    %7 = arith.addf %3, %6 : vector<8x128xf32>
    %c0_6 = arith.constant 0 : index
    %c0_7 = arith.constant 0 : index
    %8 = vector.load %arg7[%c0_6, %c0_7] : memref<8x128xf32, #tpu.memory_space<vmem>>, vector<8x128xf32>
    tpu.vector_store %arg7[%c0_6, %c0_7], %7 {strides = array<i32>} : memref<8x128xf32, #tpu.memory_space<vmem>>, vector<8x128xf32>,
    %c0_i32_8 = arith.constant 0 : i32
    %9 = arith.cmpi eq, %arg2, %c0_i32_8 : i32
    %10 = arith.extui %9 : i1 to i32
    %c0_i32_9 = arith.constant 0 : i32
    %11 = arith.cmpi ne, %10, %c0_i32_9 : i32
    scf.if %11 {
      %c0_10 = arith.constant 0 : index
      %c0_11 = arith.constant 0 : index
      %12 = vector.load %arg7[%c0_10, %c0_11] : memref<8x128xf32, #tpu.memory_space<vmem>>, vector<8x128xf32>
      %c0_12 = arith.constant 0 : index
      %c0_13 = arith.constant 0 : index
      %13 = vector.load %arg5[%c0_12, %c0_13] : memref<1x128xf32, #tpu.memory_space<vmem>>, vector<1x128xf32>
      %14 = vector.broadcast %13 : vector<1x128xf32> to vector<8x128xf32>
      %15 = arith.addf %12, %14 : vector<8x128xf32>
      %cst_14 = arith.constant 0.000000e+00 : f32
      %16 = vector.broadcast %cst_14 : f32 to vector<8x128xf32>
      %17 = arith.maximumf %15, %16 : vector<8x128xf32>
      %c0_15 = arith.constant 0 : index
      %c0_16 = arith.constant 0 : index
      %18 = vector.load %arg6[%c0_15, %c0_16] : memref<8x128xf32, #tpu.memory_space<vmem>>, vector<8x128xf32>
      tpu.vector_store %arg6[%c0_15, %c0_16], %17 {strides = array<i32>} : memref<8x128xf32, #tpu.memory_space<vmem>>, vector<8x128xf32>,
    } else {
    }
    return
  }
  func.func @transform_0(%arg0: i32, %arg1: i32, %arg2: i32) -> (i32, i32) {
    %c0_i32 = arith.constant 0 : i32
    return %arg0, %arg2 : i32, i32
  }
  func.func @transform_1(%arg0: i32, %arg1: i32, %arg2: i32) -> (i32, i32) {
    %c0_i32 = arith.constant 0 : i32
    return %arg2, %arg1 : i32, i32
  }
  func.func @transform_2(%arg0: i32, %arg1: i32, %arg2: i32) -> (i32, i32) {
    %c0_i32 = arith.constant 0 : i32
    %c0_i32_0 = arith.constant 0 : i32
    return %c0_i32, %arg1 : i32, i32
  }
  func.func @transform_3(%arg0: i32, %arg1: i32, %arg2: i32) -> (i32, i32) {
    %c0_i32 = arith.constant 0 : i32
    return %arg0, %arg1 : i32, i32
  }
}

</mosaic_0001>

<bundles_post_ra>
// kernel: tpu_custom_call.1
= control target key start
LH: loop header
LB: loop body
LE: loop exit
PB: predicated region body
PF: predicated region fallthrough
CT: control target
= control target key end

     0   :  { %8 = vsyncpa [#allocation4], 0  ;;  %s321_s0 = inlined_call_operand.hbm [shape: bf16[8,128], index: 0, kind: input, shape index: {}]   ;;  %s322_s1 = inlined_call_operand.hbm [shape: bf16[128,128], index: 1, kind: input, shape index: {}]   ;;  %s323_s2 = inlined_call_operand.vmem [shape: f32[1,128], index: 2, kind: input, shape index: {}]   ;;  %s324_s3 = inlined_call_operand.hbm [shape: f32[8,128], index: 3, kind: output, shape index: {}]  }
   0x1   :  { %9 = vsyncpa [#allocation7], 0 }
   0x2   :  { %10 = vsyncpa [#allocation5], 0  ;;  %s16_s14 = sshll.u32 %s321_s0, 4  ;;  %s284_s15 = smov [#allocation3]   ;;  %s17_s14 = int_to_ptr.hbm [resolvable:$true] %s16_s14 }
   0x3   :  { %s18_s16 = sshll.u32 %s284_s15, 4  ;;  %s26_s19 = sshll.u32 %s322_s1, 4  ;;  %s19_s16 = int_to_ptr.vmem [resolvable:$true] %s18_s16  ;;  %s27_s19 = int_to_ptr.hbm [resolvable:$true] %s26_s19 }
   0x4   :  { %21 = dma.hbm_to_vmem [thread:$0]  %s17_s14, 64, %s19_s16, [#allocation4]  }
   0x5   :  { %s285_s20 = smov [#allocation6]   ;;  %s286_s22 = smov 64  }
   0x6   :  { %s28_s21 = sshll.u32 %s285_s20, 4  ;;  %s287_s23 = smov 4   ;;  %s29_s21 = int_to_ptr.vmem [resolvable:$true] %s28_s21 }
   0x7   :  { %34 = dma.hbm_to_vmem [thread:$0]  %s27_s19, 1024, %s29_s21, [#allocation7], %s286_s22, %s286_s22, %s287_s23  }
   0x8   :  { %278 = dma.done.wait [#allocation4], 64  }
   0x9   :  { %279 = vsyncadd [#allocation4], 4294967232 }
   0xa   :  { %280 = dma.done.wait [#allocation7], 1024  }
   0xb   :  { %281 = vsyncadd [#allocation7], 4294966272  ;;  %v199_v0 = vld [vmem:[#allocation6 + $0x38] sm:$0xff]  ;;  %v198_v1 = vld [vmem:[#allocation6 + $0x30] sm:$0xff]  ;;  %s288_s24 = smov [#allocation8]   ;;  %s149_s28 = sshll.u32 %s324_s3, 4  ;;  %s150_s28 = int_to_ptr.hbm [resolvable:$true] %s149_s28 }
   0xc   :  { %116 = vmatpush.bf16.msra.mxu0 %v199_v0  ;;  %v197_v2 = vld [vmem:[#allocation6 + $0x28] sm:$0xff]  ;;  %v196_v3 = vld [vmem:[#allocation6 + $0x20] sm:$0xff]  ;;  %v195_v4 = vld [vmem:[#allocation6 + $0x18] sm:$0xff]  ;;  %s147_s25 = sshll.u32 %s288_s24, 4  ;;  %s148_s25 = int_to_ptr.vmem [resolvable:$true] %s147_s25 }
   0xd   :  { %v194_v5 = vld [vmem:[#allocation6 + $0x10] sm:$0xff]  ;;  %v193_v6 = vld [vmem:[#allocation6 + $0x8] sm:$0xff]  ;;  %v192_v7 = vld [vmem:[#allocation6] sm:$0xff] }
   0xe   :  { %v51_v8 = vld [vmem:[#allocation3] sm:$0xf] }
   0xf   :  { %v205_v9 = vld [vmem:[%s323_s2] ss:$0 sm:$0xff] }
  0x10   :  { %117 = vmatpush.bf16.msra.mxu0 %v198_v1 }
  0x14   :  { %118 = vmatpush.bf16.msra.mxu0 %v197_v2 }
  0x18   :  { %119 = vmatpush.bf16.msra.mxu0 %v196_v3 }
  0x1c   :  { %120 = vmatpush.bf16.msra.mxu0 %v195_v4 }
  0x20   :  { %121 = vmatpush.bf16.msra.mxu0 %v194_v5 }
  0x24   :  { %122 = vmatpush.bf16.msra.mxu0 %v193_v6 }
  0x28   :  { %123 = vmatpush.bf16.msra.mxu0 %v192_v7 }
  0x2b   :  { %124 = vmatmul.bf16.vlgmr.msra.gmra.mxu0 %v51_v8 }
  0xa8   :  { %v125_v10 = vpop.f32.mrf.mxu0 }
  0xa9   :  { %v139_v11 = vadd.f32 %v205_v9, %v125_v10 }
  0xab   :  { %v140_v12 = vmax.f32 %v139_v11, 0.0 }
  0xad   :  { %141 = vst [vmem:[#allocation8] sm:$0xff] %v140_v12 }
  0xae   :  { %152 = dma.vmem_to_hbm [thread:$0]  %s148_s25, 128, %s150_s28, [#allocation5]  }
  0xb0   :  { %v127_v13 = vpop.f32.mrf.mxu0 }
  0xb1   :  { %282 = dma.done.wait [#allocation5], 128  }
  0xb2   :  { %283 = vsyncadd [#allocation5], 4294967168 }
  0xb3   :  { %157 = vsyncpa [#allocation4], 1 }
  0xb4   :  { %158 = vsyncpa [#allocation7], 1 }
  0xb5   :  { %159 = vsyncpa [#allocation5], 1 }

</bundles_post_ra>
